<compile_context>
chip_gen: v7x
topology: tpu7x:2x2x1
jax: 0.10.0
libtpu: 0.0.40
codegen_flags: <defaults>
</compile_context>

<pallas_src>
import jax
import jax.numpy as jnp
from jax import lax
from jax.experimental import pallas as pl
from jax.experimental.pallas import tpu as pltpu


def _fdfem_kernel(x_ref, wqkv_ref, bqkv_ref, o_ref):
    bt, s, d = x_ref.shape

    # Merge (bt, s) into the matmul M dimension (leading-dim merge, layout no-op).
    x2 = x_ref[...].reshape(bt * s, d)

    # Fused QKV projection: one MXU pass, bf16 operands, f32 accumulation.
    proj = jnp.dot(
        x2.astype(jnp.bfloat16), wqkv_ref[...],
        preferred_element_type=jnp.float32,
    )
    proj = proj + bqkv_ref[...]                       # (bt*s, 3d) f32, bias in f32

    # Single cast for all three projections; slice afterwards.
    proj_bf = proj.astype(jnp.bfloat16)
    q = proj_bf[:, 0 * d:1 * d].reshape(bt, s, d)
    k = proj_bf[:, 1 * d:2 * d].reshape(bt, s, d)
    v = proj_bf[:, 2 * d:3 * d].reshape(bt, s, d)

    scale = 1.0 / jnp.sqrt(jnp.float32(d))
    # q @ k^T: contract over D directly (batch over bt) — no explicit transpose.
    scores = lax.dot_general(
        q, k,
        dimension_numbers=(((2,), (2,)), ((0,), (0,))),
        preferred_element_type=jnp.float32,
    ) * scale                                          # (bt, s, s) f32

    # Numerically-stable softmax over the last axis, f32 vector math.
    scores = scores - jnp.max(scores, axis=-1, keepdims=True)
    p = jnp.exp(scores)
    attn = p * pl.reciprocal(jnp.sum(p, axis=-1, keepdims=True), approx=True)

    # Weighted sum of values: (bt, s, d)
    out = lax.dot_general(
        attn.astype(jnp.bfloat16), v,
        dimension_numbers=(((2,), (1,)), ((0,), (0,))),
        preferred_element_type=jnp.float32,
    )
    o_ref[...] = out.astype(o_ref.dtype)


def _pick_batch_block(B, S):
    """Batch rows per grid step: aim for M = batch_block*S near 128 for MXU
    utilization, but keep >= 2 grid steps when B >= 2 so megacore (v7x) can
    split the batch axis. Must divide B."""
    target = max(1, 128 // max(S, 1))
    if B >= 2:
        target = min(target, max(1, B // 2))
    best = 1
    for cand in range(1, B + 1):
        if B % cand == 0 and cand <= target:
            best = cand
    return best


def fdfem_forward(x, wq, bq, wk, bk, wv, bv, *, batch_block=None):
    """x: (B, S, D). Weights are (D, D) already transposed so y = x @ W + b."""
    B, S, D = x.shape
    if batch_block is None:
        batch_block = _pick_batch_block(B, S)
    assert B % batch_block == 0

    # Fuse the three projections: one (D, 3D) bf16 weight, one (1, 3D) f32 bias.
    wqkv = jnp.concatenate([wq, wk, wv], axis=1).astype(jnp.bfloat16)
    bqkv = jnp.concatenate([bq, bk, bv]).reshape(1, 3 * D).astype(jnp.float32)

    grid = (B // batch_block,)
    return pl.pallas_call(
        _fdfem_kernel,
        out_shape=jax.ShapeDtypeStruct((B, S, D), x.dtype),
        grid=grid,
        in_specs=[
            pl.BlockSpec((batch_block, S, D), lambda b: (b, 0, 0)),   # x
            pl.BlockSpec((D, 3 * D), lambda b: (0, 0)),               # Wqkv (resident)
            pl.BlockSpec((1, 3 * D), lambda b: (0, 0)),               # bqkv (resident)
        ],
        out_specs=pl.BlockSpec((batch_block, S, D), lambda b: (b, 0, 0)),
        compiler_params=pltpu.CompilerParams(
            dimension_semantics=("parallel",),
        ),
    )(x, wqkv, bqkv)


def fdfem_reference(x, wq, bq, wk, bk, wv, bv):
    q = x @ wq + bq
    k = x @ wk + bk
    v = x @ wv + bv
    scores = jnp.einsum("bqd,bkd->bqk", q, k) / jnp.sqrt(jnp.float32(x.shape[-1]))
    attn = jax.nn.softmax(scores, axis=-1)
    return jnp.einsum("bqk,bkd->bqd", attn, v)


if __name__ == "__main__":
    B, S, D = 2, 8, 32  # batch, seq, input_size

    key = jax.random.PRNGKey(0)
    kx, kq, kbq, kk, kbk, kv_, kbv = jax.random.split(key, 7)

    x = jax.random.normal(kx, (B, S, D), dtype=jnp.float32)

    # Deterministic parameter init (roughly PyTorch Linear's uniform scale).
    lim = 1.0 / jnp.sqrt(jnp.float32(D))
    wq = jax.random.uniform(kq, (D, D), minval=-lim, maxval=lim, dtype=jnp.float32)
    bq = jax.random.uniform(kbq, (D,), minval=-lim, maxval=lim, dtype=jnp.float32)
    wk = jax.random.uniform(kk, (D, D), minval=-lim, maxval=lim, dtype=jnp.float32)
    bk = jax.random.uniform(kbk, (D,), minval=-lim, maxval=lim, dtype=jnp.float32)
    wv = jax.random.uniform(kv_, (D, D), minval=-lim, maxval=lim, dtype=jnp.float32)
    bv = jax.random.uniform(kbv, (D,), minval=-lim, maxval=lim, dtype=jnp.float32)

    out = fdfem_forward(x, wq, bq, wk, bk, wv, bv)
    out = jax.block_until_ready(out)

    ref = fdfem_reference(x, wq, bq, wk, bk, wv, bv)
    assert out.shape == (B, S, D)
    # bf16 MXU operands + approx reciprocal -> loosened tolerance vs f32 reference.
    max_err = float(jnp.max(jnp.abs(out - ref)))
    assert jnp.allclose(out, ref, atol=2e-2, rtol=2e-2), f"max abs err {max_err}"

    print("KERNEL_OK")
</pallas_src>

<mosaic_0001>
module attributes {stable_mosaic.version = 11 : i64} {
  func.func @_fdfem_kernel(%arg0: i32, %arg1: memref<1x8x32xf32, #tpu.memory_space<vmem>>, %arg2: memref<32x96xbf16, #tpu.memory_space<vmem>>, %arg3: memref<1x96xf32, #tpu.memory_space<vmem>>, %arg4: memref<1x8x32xf32, #tpu.memory_space<vmem>>) attributes {dimension_semantics = [#tpu.dimension_semantics<parallel>], iteration_bounds = array<i64: 2>, scalar_prefetch = 0 : i64, scratch_operands = 0 : i64, tpu.core_type = #tpu.core_type<tc>, window_params = [{transform_indices = @transform_0, window_bounds = array<i64: 1, 8, 32>}, {pipeline_mode = #tpu.pipeline_mode<synchronous>, transform_indices = @transform_1, window_bounds = array<i64: 32, 96>}, {pipeline_mode = #tpu.pipeline_mode<synchronous>, transform_indices = @transform_2, window_bounds = array<i64: 1, 96>}, {transform_indices = @transform_3, window_bounds = array<i64: 1, 8, 32>}]} {
    %c0 = arith.constant 0 : index
    %c0_0 = arith.constant 0 : index
    %c0_1 = arith.constant 0 : index
    %0 = vector.load %arg1[%c0, %c0_0, %c0_1] : memref<1x8x32xf32, #tpu.memory_space<vmem>>, vector<1x8x32xf32>
    %1 = vector.shape_cast %0 : vector<1x8x32xf32> to vector<8x32xf32>
    %2 = arith.truncf %1 : vector<8x32xf32> to vector<8x32xbf16>
    %c0_2 = arith.constant 0 : index
    %c0_3 = arith.constant 0 : index
    %3 = vector.load %arg2[%c0_2, %c0_3] : memref<32x96xbf16, #tpu.memory_space<vmem>>, vector<32x96xbf16>
    %cst = arith.constant dense<0.000000e+00> : vector<8x96xf32>
    %4 = tpu.matmul %2, %3, %cst {dimension_numbers = #tpu.dot_dimension_numbers<[1], [0], [0], [1], [0, 0, 1, 1], [], []>} : vector<8x32xbf16>, vector<32x96xbf16>, vector<8x96xf32> -> vector<8x96xf32>
    %c0_4 = arith.constant 0 : index
    %c0_5 = arith.constant 0 : index
    %5 = vector.load %arg3[%c0_4, %c0_5] : memref<1x96xf32, #tpu.memory_space<vmem>>, vector<1x96xf32>
    %6 = vector.broadcast %5 : vector<1x96xf32> to vector<8x96xf32>
    %7 = arith.addf %4, %6 : vector<8x96xf32>
    %8 = arith.truncf %7 : vector<8x96xf32> to vector<8x96xbf16>
    %9 = vector.extract_strided_slice %8 {offsets = [0, 0], sizes = [8, 32], strides = [1, 1]} : vector<8x96xbf16> to vector<8x32xbf16>
    %10 = vector.shape_cast %9 : vector<8x32xbf16> to vector<1x8x32xbf16>
    %11 = vector.extract_strided_slice %8 {offsets = [0, 32], sizes = [8, 32], strides = [1, 1]} : vector<8x96xbf16> to vector<8x32xbf16>
    %12 = vector.shape_cast %11 : vector<8x32xbf16> to vector<1x8x32xbf16>
    %13 = vector.extract_strided_slice %8 {offsets = [0, 64], sizes = [8, 32], strides = [1, 1]} : vector<8x96xbf16> to vector<8x32xbf16>
    %14 = vector.shape_cast %13 : vector<8x32xbf16> to vector<1x8x32xbf16>
    %cst_6 = arith.constant 3.200000e+01 : f32
    %15 = math.sqrt %cst_6 : f32
    %cst_7 = arith.constant 1.000000e+00 : f32
    %16 = arith.divf %cst_7, %15 : f32
    %cst_8 = arith.constant dense<0.000000e+00> : vector<1x8x8xf32>
    %17 = tpu.matmul %10, %12, %cst_8 {dimension_numbers = #tpu.dot_dimension_numbers<[2], [2], [1], [1], [0, 0, 0, 1, 1, 1], [0], [0]>} : vector<1x8x32xbf16>, vector<1x8x32xbf16>, vector<1x8x8xf32> -> vector<1x8x8xf32>
    %18 = vector.broadcast %16 : f32 to vector<1x8x8xf32>
    %19 = arith.mulf %17, %18 : vector<1x8x8xf32>
    %cst_9 = arith.constant dense<0xFF800000> : vector<1x8xf32>
    %20 = vector.multi_reduction <maximumf>, %19, %cst_9 [2] : vector<1x8x8xf32> to vector<1x8xf32>
    %21 = vector.shape_cast %20 : vector<1x8xf32> to vector<1x8x1xf32>
    %22 = vector.broadcast %21 : vector<1x8x1xf32> to vector<1x8x8xf32>
    %23 = arith.subf %19, %22 : vector<1x8x8xf32>
    %24 = math.exp %23 : vector<1x8x8xf32>
    %cst_10 = arith.constant dense<0.000000e+00> : vector<1x8xf32>
    %25 = vector.multi_reduction <add>, %24, %cst_10 [2] : vector<1x8x8xf32> to vector<1x8xf32>
    %26 = vector.shape_cast %25 : vector<1x8xf32> to vector<1x8x1xf32>
    %27 = tpu.reciprocal %26 {approx = true} : vector<1x8x1xf32> -> vector<1x8x1xf32>
    %28 = vector.broadcast %27 : vector<1x8x1xf32> to vector<1x8x8xf32>
    %29 = arith.mulf %24, %28 : vector<1x8x8xf32>
    %30 = arith.truncf %29 : vector<1x8x8xf32> to vector<1x8x8xbf16>
    %cst_11 = arith.constant dense<0.000000e+00> : vector<1x8x32xf32>
    %31 = tpu.matmul %30, %14, %cst_11 {dimension_numbers = #tpu.dot_dimension_numbers<[2], [1], [1], [2], [0, 0, 0, 1, 1, 2], [0], [0]>} : vector<1x8x8xbf16>, vector<1x8x32xbf16>, vector<1x8x32xf32> -> vector<1x8x32xf32>
    %c0_12 = arith.constant 0 : index
    %c0_13 = arith.constant 0 : index
    %c0_14 = arith.constant 0 : index
    %32 = vector.load %arg4[%c0_12, %c0_13, %c0_14] : memref<1x8x32xf32, #tpu.memory_space<vmem>>, vector<1x8x32xf32>
    tpu.vector_store %arg4[%c0_12, %c0_13, %c0_14], %31 {strides = array<i32>} : memref<1x8x32xf32, #tpu.memory_space<vmem>>, vector<1x8x32xf32>,
    return
  }
  func.func @transform_0(%arg0: i32) -> (i32, i32, i32) {
    %c0_i32 = arith.constant 0 : i32
    %c0_i32_0 = arith.constant 0 : i32
    %c0_i32_1 = arith.constant 0 : i32
    return %arg0, %c0_i32, %c0_i32_0 : i32, i32, i32
  }
  func.func @transform_1(%arg0: i32) -> (i32, i32) {
    %c0_i32 = arith.constant 0 : i32
    %c0_i32_0 = arith.constant 0 : i32
    %c0_i32_1 = arith.constant 0 : i32
    return %c0_i32, %c0_i32_0 : i32, i32
  }
  func.func @transform_2(%arg0: i32) -> (i32, i32) {
    %c0_i32 = arith.constant 0 : i32
    %c0_i32_0 = arith.constant 0 : i32
    %c0_i32_1 = arith.constant 0 : i32
    return %c0_i32, %c0_i32_0 : i32, i32
  }
  func.func @transform_3(%arg0: i32) -> (i32, i32, i32) {
    %c0_i32 = arith.constant 0 : i32
    %c0_i32_0 = arith.constant 0 : i32
    %c0_i32_1 = arith.constant 0 : i32
    return %arg0, %c0_i32, %c0_i32_0 : i32, i32, i32
  }
}

</mosaic_0001>

<bundles_post_ra>
// kernel: tpu_custom_call.1
= control target key start
LH: loop header
LB: loop body
LE: loop exit
PB: predicated region body
PF: predicated region fallthrough
CT: control target
= control target key end

     0   :  { %8 = vsyncpa [#allocation3], 0  ;;  %s964_s0 = inlined_call_operand.hbm [shape: f32[2,8,32], index: 0, kind: input, shape index: {}]   ;;  %s965_s1 = inlined_call_operand.hbm [shape: bf16[32,96], index: 1, kind: input, shape index: {}]   ;;  %s966_s2 = inlined_call_operand.vmem [shape: f32[1,96], index: 2, kind: input, shape index: {}]   ;;  %s967_s3 = inlined_call_operand.hbm [shape: f32[2,8,32], index: 3, kind: output, shape index: {}]  }
   0x1   :  { %10 = vsyncpa [#allocation3 + $0x1], 0 }
   0x2   :  { %11 = vsyncpa [#allocation6], 0 }
   0x3   :  { %12 = vsyncpa [#allocation4], 0 }
   0x4   :  { %14 = vsyncpa [#allocation4 + $0x1], 0  ;;  %s754_s12 = smov 0   ;;  %s756_s13 = smov 0  }
   0x5   :  { %s758_s14 = smov 0   ;;  %s760_s15 = smov 0  }
   0x6 LB: > { %s775_s16 = sadd.s32 4294967295, %s723_s15   ;;  %s479_s17 = sadd.s32 4294967294, %s723_s15   ;;  %s723_s15 = sphi %s760_s15, %s987_s15   ;;  %s719_s14 = sphi %s758_s14, %s986_s14   ;;  %s715_s13 = sphi %s756_s13, %s985_s13   ;;  %s711_s12 = sphi %s754_s12, %s984_s12  }
   0x7   : > { %p40_p0 = scmp.ne.s32.totalorder %s715_s13, %s711_s12  ;;  %p968_p1 = scmp.eq.s32.totalorder %s775_s16, 0 }
   0x8   : > { %p112_p3 = scmp.eq.s32.totalorder %s479_s17, 1  ;;  %p480_p5 = scmp.ge.s32.totalorder %s723_s15, 1 }
   0x9   : > { %p784_p4 = por %p968_p1, %p40_p0  ;;  %p119_p7 = scmp.lt.s32.totalorder %s723_s15, 3 }
   0xa   : > { %p789_p6 = por %p112_p3, %p40_p0  ;;  %s725_s21 = smov [#allocation5]  }
   0xb   : > { %s971_s18 = scalar_select %p784_p4, 1, 0 }
   0xc   : > { %s972_s19 = scalar_select %p789_p6, 1, 0 }
   0xd   : > { %p794_p8 = pnand %p480_p5, %p119_p7  ;;  %s131_s22 = sshll.u32 %s725_s21, 4  ;;  %s798_s22 = int_to_ptr.vmem [resolvable:$true] %s131_s22 }
   0xe   : > { %s810_s24 = sadd.s32 1, %s723_s15   ;;  %s27_s25 = sadd.s32 1, %s719_s14 }
   0xf   : > { %s973_s20 = scalar_select %p794_p8, 1, 0 }
  0x10   : > { %p534_p9 = pneg %p794_p8  ;;  %s24_s26 = ssub.s32 %s723_s15, %s810_s24 }
  0x11   : > { %s595_s29 = scalar_lea.hbm %s965_s1, 256 }
  0x12   : > { %p805_p11 = pnand %p534_p9, %p968_p1  ;;  %p596_p12 = scmp.ne.s32.totalorder %s965_s1, %s595_s29 }
  0x13   : > { %p602_p5 = scmp.lt.u32.totalorder %s595_s29, %s965_s1 }
  0x14   : > { %p597_p13 = pneg %p805_p11 }
  0x16   : > { %p598_p0 = pnand %p597_p13, %p596_p12 }
  0x18   : > { %p599_p3 = pneg %p598_p0 }
  0x1a   : > { %p604_p7 = pnand %p602_p5, %p599_p3 }
  0x1c   : > { %607 = shalt.err (!%p604_p7)
}
  0x1d   : > { %s608_s7 = scalar_lea.vmem %s798_s22, 256  ;;  %p616_p2 = scmp.lt.s32.totalorder %s798_s22, %s798_s22 }
  0x1e   : > { %p609_p9 = scmp.ne.s32.totalorder %s798_s22, %s608_s7  ;;  %p617_p6 = scmp.lt.s32.totalorder %s608_s7, %s608_s7 }
  0x20   : > { %p611_p10 = pnand %p609_p9, %p597_p13  ;;  %p618_p4 = por %p617_p6, %p616_p2 }
  0x22   : > { %p612_p1 = pneg %p611_p10 }
  0x24   : > { %p619_p8 = pnand %p618_p4, %p612_p1 }
  0x26   : > { %622 = shalt.err (!%p619_p8)
}
  0x27   : > { %s726_s8 = smov 64   ;;  %s727_s9 = smov 4  }
  0x28   : > { %537 = dma.hbm_to_vmem [thread:$0]  (!%p805_p11), %s965_s1, 256, %s798_s22, [#allocation6], %s726_s8, %s726_s8, %s727_s9  }
  0x29   : > { %p25_p2 = scmp.eq.s32.totalorder %s24_s26, 0  ;;  %p34_p1 = scmp.ne.s32.totalorder %s719_s14, %s715_s13 }
  0x2a   : > { %p35_p4 = scmp.eq.s32.totalorder %s723_s15, 0  ;;  %p547_p6 = scmp.lt.s32.totalorder %s723_s15, 2 }
  0x2b   : > { %s841_s17 = scalar_select %p25_p2, %s719_s14, %s27_s25  }
  0x2c   : > { %p36_p8 = por %p35_p4, %p34_p1  ;;  %p975_p10 = scmp.eq.s32.totalorder %s775_s16, 1 }
  0x2d   : > { %s148_s27 = sand.u32 1, %s719_s14   ;;  %s484_s28 = sshll.u32 %s723_s15, 7 }
  0x2e   : > { %p845_p12 = por %p975_p10, %p34_p1  ;;  %s483_s29 = sshll.u32 %s148_s27, 3 }
  0x2f   : > { %s854_s4 = scalar_lea.hbm %s964_s0, %s484_s28  ;;  %s152_s22 = scalar_lea.vmem [#allocation2], %s483_s29 }
  0x30   : > { %s159_s25 = sshll.u32 %s152_s22, 4  ;;  %p856_p11 = pnand %p547_p6, %p36_p8  ;;  %s860_s25 = int_to_ptr.vmem [resolvable:$true] %s159_s25 }
  0x31   : > { %s149_s5 = scalar_lea.sflag [#allocation3], %s148_s27  ;;  %s623_s6 = scalar_lea.hbm %s854_s4, 128 }
  0x32   : > { %p624_p13 = scmp.ne.s32.totalorder %s854_s4, %s623_s6  ;;  %p625_p0 = pneg %p856_p11 }
  0x33   : > { %s628_s9 = scalar_lea.hbm %s964_s0, 256  ;;  %p629_p7 = scmp.lt.u32.totalorder %s854_s4, %s964_s0 }
  0x34   : > { %p626_p3 = pnand %p625_p0, %p624_p13  ;;  %p630_p9 = scmp.lt.u32.totalorder %s628_s9, %s623_s6 }
  0x35   : > { %p632_p1 = scmp.lt.u32.totalorder %s623_s6, %s854_s4 }
  0x36   : > { %p627_p5 = pneg %p626_p3  ;;  %p631_p2 = por %p630_p9, %p629_p7 }
  0x38   : > { %p633_p4 = por %p632_p1, %p631_p2 }
  0x3a   : > { %p634_p6 = pnand %p633_p4, %p627_p5 }
  0x3c   : > { %637 = shalt.err (!%p634_p6)
}
  0x3d   : > { %s638_s27 = scalar_lea.vmem %s860_s25, 128  ;;  %s728_s28 = smov [#allocation2]  }
  0x3e   : > { %p639_p8 = scmp.ne.s32.totalorder %s860_s25, %s638_s27  ;;  %s643_s29 = sshll.u32 %s728_s28, 4  ;;  %s644_s29 = int_to_ptr.vmem [resolvable:$false] %s643_s29 }
  0x3f   : > { %s645_s23 = scalar_lea.vmem %s644_s29, 256  ;;  %p646_p3 = scmp.lt.s32.totalorder %s860_s25, %s644_s29 }
  0x40   : > { %p641_p10 = pnand %p639_p8, %p625_p0  ;;  %p647_p7 = scmp.lt.s32.totalorder %s645_s23, %s638_s27 }
  0x42   : > { %p642_p13 = pneg %p641_p10  ;;  %p648_p9 = por %p647_p7, %p646_p3 }
  0x44   : > { %p649_p2 = pnand %p648_p9, %p642_p13 }
  0x46   : > { %652 = shalt.err (!%p649_p2)
}
  0x47   : > { %541 = dma.hbm_to_vmem [thread:$0]  (!%p856_p11), %s854_s4, 128, %s860_s25, %s149_s5  }
  0x48   : > { %p978_p5 = scmp.ne.s32.totalorder %s973_s20, 0 }
  0x49   : > { %s890_s30 = sand.u32 (!%p978_p5), 1, %s715_s13   ;;  %p979_p0 = scmp.ne.s32.totalorder (!%p978_p5), %s971_s18, 0 }
  0x4a   : > { %168 = sbr.rel (%p978_p5) target bundleno = 1191 (0x4a7), region = 32  ;;  %s486_s22 = sshll.u32 (!%p978_p5), %s890_s30, 3 }
  0x4b   : > { %s171_s6 = scalar_lea.sflag (!%p978_p5), [#allocation3], %s890_s30  ;;  %s174_s7 = scalar_lea.vmem (!%p978_p5), [#allocation2], %s486_s22 }
  0x51   : > { %698 = dma.done.wait (%p979_p0), %s171_s6, 128  }
  0x52   : > { %700 = vsyncadd (%p979_p0), %s171_s6, 4294967168  ;;  %p980_p11 = scmp.eq.s32.totalorder %s775_s16, 0 }
  0x54   : > { %702 = dma.done.wait (%p980_p11), [#allocation6], 256   ;;  %p981_p1 = pmov %p980_p11 }
  0x55   : > { %v729_v0 = vmov 0.0   ;;  %vm730_vm0 = vmmov 0   ;;  %v589_v1 = vld [vmem:[#allocation5] sm:$0xff]   ;;  %v590_v2 = vld [vmem:[#allocation5 + $0x8] sm:$0xff]   ;;  %v202_v3 = vld [vmem:[%s174_s7] sm:$0xff]  ;;  %vm227_vm1 = vcmask 261120  }
  0x56   : > { %704 = vsyncadd (%p981_p1), [#allocation6], 4294967040  ;;  %506 = vmatprep.subr.bf16.mxu0 %v729_v0  ;;  %510 = vmatprep.mubr.msk.bf16.mxu0 %vm730_vm0, %v729_v0  ;;  %v203_v4 = vpack.c.bf16 %v202_v3, %v202_v3  ;;  %v489_v5 = vld [vmem:[%s966_s2] ss:$0 sm:$0xff]  ;;  %s731_s4 = smov 96   ;;  %vm322_vm2 = vcmask 64512  }
  0x57   : > { %514 = vmatprep.subr.bf16.mxu1 %v729_v0  ;;  %516 = vmatprep.mubr.msk.bf16.mxu1 %vm730_vm0, %v729_v0  ;;  %s732_s25 = smov 64   ;;  %vm340_vm3 = vcmask 1043456   ;;  %s496_s26 = sshll.u32 %s775_s16, 7 }
  0x58   : > { %507 = vmatpush3.bf16.msra.mxu0 %v589_v1  ;;  %s200_s5 = scalar_lea.vmem [#allocation7], %s486_s22  ;;  %s919_s11 = scalar_lea.hbm %s967_s3, %s496_s26 }
  0x59   : > { %508 = vmatprep.subr.bf16.mxu0 %v729_v0  ;;  %s399_s8 = sshll.u32 %s200_s5, 4  ;;  %s386_s27 = scalar_lea.sflag [#allocation4], %s890_s30  ;;  %s921_s8 = int_to_ptr.vmem [resolvable:$true] %s399_s8 }
  0x5a   : > { %s653_s16 = scalar_lea.vmem %s921_s8, 128  ;;  %s733_s28 = smov [#allocation7]  }
  0x5b   : > { %p654_p4 = scmp.ne.s32.totalorder %s921_s8, %s653_s16  ;;  %s657_s29 = sshll.u32 %s733_s28, 4  ;;  %s658_s29 = int_to_ptr.vmem [resolvable:$false] %s657_s29 }
  0x5c   : > { %509 = vmatpush3.bf16.msra.mxu0 %v590_v2  ;;  %s659_s23 = scalar_lea.vmem %s658_s29, 256  ;;  %p660_p10 = scmp.lt.s32.totalorder %s921_s8, %s658_s29 }
  0x5d   : > { %520 = vmatprep.subr.bf16.mxu0 %v729_v0  ;;  %p655_p6 = pnand %p654_p4, %p845_p12  ;;  %p661_p13 = scmp.lt.s32.totalorder %s659_s23, %s653_s16 }
  0x5f   : > { %511 = vmatmul.mubr.msk.bf16.vlgmr.msra.gmra.mrb[0].mxu0 %vm227_vm1, %v203_v4  ;;  %p656_p8 = pneg %p655_p6  ;;  %p662_p3 = por %p661_p13, %p660_p10 }
  0x60   : > { %522 = vmatprep.mubr.msk.bf16.mxu0 %vm730_vm0, %v729_v0 }
  0x61   : > { %p663_p7 = pnand %p662_p3, %p656_p8 }
 0x132   : > { %v265_v6 = vpop.f32.mrb[0].mxu0 }
 0x133   : > { %v266_v7 = vadd.f32 %v489_v5, %v265_v6  ;;  %v512_v8 = vpop.f32.mrb[1].mxu0 }
 0x134   : > { %v268_v9 = vpop.f32.mrb[2].mxu0 }
 0x135   : > { %v271_v10 = vpack.c.bf16 %v266_v7, %v266_v7  ;;  %v513_v11 = vpop.f32.mrb[3].mxu0 }
 0x137   : > { %273 = vrot.lane.b32.xlu0 %v271_v10, %s731_s4 }
 0x1a9   : > { %v274_v12 = vpop.permute.xlu0 %273 }
 0x1aa   : > { %v279_v13 = vsel %vm227_vm1, %v274_v12, 0 }
 0x1ab   : > { %515 = vmatpush3.bf16.xpose.msra.mxu1 %v279_v13 }
 0x1b2   : > { %517 = vmatmul.mubr.msk.bf16.vlgmr.msra.gmra.mrb[0].mxu1 %vm227_vm1, %v271_v10 }
 0x285   : > { %v315_v14 = vpop.f32.mrb[0].mxu1 }
 0x286   : > { %v321_v15 = vmul.f32 0.17677669, %v315_v14  ;;  %v518_v16 = vpop.f32.mrb[1].mxu1 }
 0x287   : > { %v318_v17 = vpop.f32.mrb[2].mxu1 }
 0x288   : > { %v519_v18 = vpop.f32.mrb[3].mxu1  ;;  %v323_v19 = vsel %vm322_vm2, %v321_v15, -inf }
 0x289   : > { %324 = vmax.xlane.f32.xlu0 %v323_v19 }
 0x316   : > { %v325_v20 = vpop.xlane.xlu0 %324 }
 0x317   : > { %v326_v21 = vsub.f32 %v321_v15, %v325_v20 }
 0x319   : > { %v327_v22 = vmul.f32 1.442695, %v326_v21 }
 0x31b   : > { %591 = vpow2.f32 %v327_v22 }
 0x325   : > { %v592_v23 = vpop.eup %591 }
 0x326   : > { %v329_v24 = vsel %vm322_vm2, %v592_v23, 0.0 }
 0x327   : > { %330 = vadd.xlane.f32.xlu1 %v329_v24 }
 0x338   : > { %335 = vrot.lane.b32.xlu1 %v271_v10, %s732_s25 }
 0x3b4   : > { %v331_v25 = vpop.xlane.xlu1 %330 }
 0x3b5   : > { %593 = vrcp.f32 %v331_v25 }
 0x3b8   : > { %v336_v26 = vpop.permute.xlu1 %335 }
 0x3b9   : > { %v342_v27 = vsel %vm340_vm3, %v336_v26, 0 }
 0x3ba   : > { %521 = vmatpush3.bf16.msra.mxu0 %v342_v27 }
 0x3bf   : > { %v594_v28 = vpop.eup %593 }
 0x3c0   : > { %v333_v29 = vmul.f32 %v594_v28, %v592_v23 }
 0x3c2   : > { %v334_v30 = vpack.c.bf16 %v333_v29, %v333_v29 }
 0x3c4   : > { %523 = vmatmul.mubr.msk.bf16.vlgmr.msra.gmra.mrb[4].mxu0 %vm322_vm2, %v334_v30 }
 0x497   : > { %v378_v31 = vpop.f32.mrb[4].mxu0 }
 0x498   : > { %384 = vst.msk [vmem:[%s200_s5] sm:$0xff] %vm227_vm1, %v378_v31  ;;  %v524_v32 = vpop.f32.mrb[5].mxu0 }
 0x499   : > { %v381_v33 = vpop.f32.mrb[6].mxu0 }
 0x49a   : > { %666 = shalt.err (!%p663_p7)
}
 0x49b   : > { %s667_s30 = scalar_lea.hbm %s919_s11, 128  ;;  %s671_s7 = scalar_lea.hbm %s967_s3, 256 }
 0x49c   : > { %p668_p9 = scmp.ne.s32.totalorder %s919_s11, %s667_s30  ;;  %p672_p0 = scmp.lt.u32.totalorder %s919_s11, %s967_s3 }
 0x49d   : > { %p673_p11 = scmp.lt.u32.totalorder %s671_s7, %s667_s30  ;;  %p675_p4 = scmp.lt.u32.totalorder %s667_s30, %s919_s11 }
 0x49e   : > { %p669_p2 = pnand %p668_p9, %p845_p12 }
 0x49f   : > { %p674_p1 = por %p673_p11, %p672_p0 }
 0x4a0   : > { %p670_p5 = pneg %p669_p2 }
 0x4a1   : > { %p676_p6 = por %p675_p4, %p674_p1 }
 0x4a3   : > { %p677_p8 = pnand %p676_p6, %p670_p5 }
 0x4a5   : > { %680 = shalt.err (!%p677_p8)
}
 0x4a6   : > { %532 = dma.vmem_to_hbm [thread:$0]  (%p845_p12), %s921_s8, 128, %s919_s11, %s386_s27   ;;  %v525_v34 = vpop.f32.mrb[7].mxu0 }
 0x4a7 PF: > { %s411_s4 = sand.u32 1, %s711_s12   ;;  %p982_p10 = scmp.ne.s32.totalorder %s972_s19, 0 }
 0x4a8   : > { %p983_p13 = scmp.ge.s32.totalorder %s723_s15, 2  ;;  %s412_s25 = scalar_lea.sflag [#allocation4], %s411_s4 }
 0x4aa   : > { %p543_p3 = pnand %p983_p13, %p982_p10 }
 0x4ac   : > { %706 = dma.done.wait (!%p543_p3), %s412_s25, 128  }
 0x4ad   : > { %708 = vsyncadd (!%p543_p3), %s412_s25, 4294967168  ;;  %p17_p7 = scmp.ge.s32.totalorder %s810_s24, 4   ;;  %s984_s12 = smov %s715_s13 }
 0x4ae   : > { %s985_s13 = smov %s719_s14  ;;  %s986_s14 = smov %s841_s17 }
 0x4af   : > { %s987_s15 = smov %s810_s24  ;;  %19 = sbr.rel (!%p17_p7) target bundleno = 6 (0x6), region = 81 }
 0x4b6   :  { %417 = vsyncpa [#allocation3], 1 }
 0x4b7   :  { %419 = vsyncpa [#allocation3 + $0x1], 1 }
 0x4b8   :  { %420 = vsyncpa [#allocation6], 1 }
 0x4b9   :  { %421 = vsyncpa [#allocation4], 1 }
 0x4ba   :  { %423 = vsyncpa [#allocation4 + $0x1], 1 }

</bundles_post_ra>
